<compile_context>
chip_gen: v7x
topology: tpu7x:2x2x1
jax: 0.10.0
libtpu: 0.0.40
codegen_flags: <defaults>
</compile_context>

<pallas_src>
import jax
import jax.numpy as jnp
from jax.experimental import pallas as pl
from jax.experimental.pallas import tpu as pltpu

EPS = 1e-8


def _fused_conv_rescale_kernel(w_ref, p_ref, ynew_ref, neww_ref):
    """Single fused step:
         y^T    = bf16(W) @ P        MXU, f32 accumulate          (Cout, M)
         cov_c  = mean_M y^2         XLU lane reduce              (Cout, 1)
         inv_c  = rsqrt(cov_c+eps)   EUP, once per channel        (Cout, 1)
         ynew^T = y * inv            VPU, lane-dense store        (Cout, M)
         W_new  = W_f32 * inv        fused torch weight rescale   (Cout, K)
    """
    w = w_ref[...]                                              # (Cout, K) f32
    y = jnp.dot(w.astype(jnp.bfloat16), p_ref[...],
                preferred_element_type=jnp.float32)             # (Cout, M) f32
    m = y.shape[-1]                                             # static
    cov = jnp.sum(y * y, axis=-1, keepdims=True) * (1.0 / m)    # (Cout, 1)
    inv = jax.lax.rsqrt(cov + EPS)                              # (Cout, 1)
    ynew_ref[...] = y * inv
    neww_ref[...] = w * inv


def fused_conv_rescale(w_t, patches_t):
    """w_t: (Cout, K) f32, patches_t: (K, M) bf16 with M = B*H*W.
    Returns (ynew^T f32 (Cout, M), new_weight f32 (Cout, K))."""
    Cout, K = w_t.shape
    K2, M = patches_t.shape
    assert K == K2
    # Whole (tiny) problem is VMEM-resident in a single grid step.
    vmem_bytes = Cout * K * 4 + K * M * 2 + (Cout * M + Cout * K) * 4
    assert vmem_bytes < 16 * 1024 * 1024, "single-block kernel assumes problem fits VMEM"

    return pl.pallas_call(
        _fused_conv_rescale_kernel,
        out_shape=(
            jax.ShapeDtypeStruct((Cout, M), jnp.float32),   # ynew^T
            jax.ShapeDtypeStruct((Cout, K), jnp.float32),   # rescaled weight
        ),
        grid_spec=pltpu.PrefetchScalarGridSpec(
            num_scalar_prefetch=0,
            grid=(1,),
            in_specs=[
                pl.BlockSpec((Cout, K), lambda i: (0, 0)),
                pl.BlockSpec((K, M), lambda i: (0, 0)),
            ],
            out_specs=(
                pl.BlockSpec((Cout, M), lambda i: (0, 0)),
                pl.BlockSpec((Cout, K), lambda i: (0, 0)),
            ),
        ),
        compiler_params=pltpu.CompilerParams(dimension_semantics=("arbitrary",)),
    )(w_t, patches_t)


@jax.jit
def weight_rescaler_forward(x_nchw, w_oihw):
    """Returns (ynew_nchw, new_weight_oihw) — the module's return value plus
    the functionalized weight mutation."""
    B, Cin, H, W = x_nchw.shape
    Cout, _, kh, kw = w_oihw.shape
    M = B * H * W
    K = Cin * kh * kw

    # --- glue: im2col in bf16, transposed so M = B*H*W lands on the lane axis ---
    # TODO(synk): for large activations, move im2col into the kernel as kh*kw
    # shifted matmuls on the padded input to avoid the K-fold HBM inflation.
    ph, pw = kh // 2, kw // 2
    xp = jnp.pad(x_nchw.astype(jnp.bfloat16),
                 ((0, 0), (0, 0), (ph, ph), (pw, pw)))              # (B, Cin, H+2, W+2)
    taps = [xp[:, :, dh:dh + H, dw:dw + W] for dh in range(kh) for dw in range(kw)]
    p = jnp.stack(taps, axis=2)                                      # (B, Cin, kh*kw, H, W)
    patches_t = jnp.transpose(p, (1, 2, 0, 3, 4)).reshape(K, M)      # (K, M), K-order = (Cin, dh, dw)
    w_t = w_oihw.astype(jnp.float32).reshape(Cout, K)                # OIHW -> (Cout, Cin*kh*kw)

    # --- single fused Pallas kernel ---
    ynew_t, neww_t = fused_conv_rescale(w_t, patches_t)

    # (Cout, B*H*W) -> NCHW with a single transpose; weight back to OIHW.
    ynew = jnp.transpose(ynew_t.reshape(Cout, B, H, W), (1, 0, 2, 3))
    new_weight = neww_t.reshape(Cout, Cin, kh, kw)
    return ynew, new_weight


if __name__ == "__main__":
    key = jax.random.PRNGKey(0)
    kx, kw_key = jax.random.split(key)

    B, Cin, H, W = 2, 4, 16, 16
    Cout, kh, kw = 8, 3, 3

    x = jax.random.normal(kx, (B, Cin, H, W), dtype=jnp.float32)
    # deterministic synthetic conv weight (kaiming-ish scale), OIHW like torch.nn.Conv2d
    weight = jax.random.normal(kw_key, (Cout, Cin, kh, kw), dtype=jnp.float32) * 0.1

    ynew, new_weight = weight_rescaler_forward(x, weight)
    jax.block_until_ready((ynew, new_weight))

    # --- reference in plain JAX, with inputs rounded to bf16 to match the kernel's
    #     bf16-operand / f32-accumulate MXU matmul ---
    xq = x.astype(jnp.bfloat16).astype(jnp.float32)
    wq = weight.astype(jnp.bfloat16).astype(jnp.float32)
    y_ref = jax.lax.conv_general_dilated(
        xq, wq, window_strides=(1, 1), padding="SAME",
        dimension_numbers=("NCHW", "OIHW", "NCHW"))
    cov_ref = jnp.mean(y_ref ** 2, axis=(0, 2, 3))                   # (Cout,)
    ynew_ref = y_ref / jnp.sqrt(cov_ref + EPS)[None, :, None, None]
    new_weight_ref = weight / jnp.sqrt(cov_ref + EPS)[:, None, None, None]

    assert ynew.shape == (B, Cout, H, W)
    assert new_weight.shape == (Cout, Cin, kh, kw)
    assert jnp.allclose(ynew, ynew_ref, atol=1e-3, rtol=1e-3)
    assert jnp.allclose(new_weight, new_weight_ref, atol=1e-3, rtol=1e-3)

    print("KERNEL_OK")
</pallas_src>

<mosaic_0001>
module attributes {stable_mosaic.version = 11 : i64} {
  func.func @_fused_conv_rescale_kernel(%arg0: i32, %arg1: memref<8x36xf32, #tpu.memory_space<vmem>>, %arg2: memref<36x512xbf16, #tpu.memory_space<vmem>>, %arg3: memref<8x512xf32, #tpu.memory_space<vmem>>, %arg4: memref<8x36xf32, #tpu.memory_space<vmem>>) attributes {dimension_semantics = [#tpu.dimension_semantics<arbitrary>], iteration_bounds = array<i64: 1>, scalar_prefetch = 0 : i64, scratch_operands = 0 : i64, tpu.core_type = #tpu.core_type<tc>, window_params = [{pipeline_mode = #tpu.pipeline_mode<synchronous>, transform_indices = @transform_0, window_bounds = array<i64: 8, 36>}, {pipeline_mode = #tpu.pipeline_mode<synchronous>, transform_indices = @transform_1, window_bounds = array<i64: 36, 512>}, {pipeline_mode = #tpu.pipeline_mode<synchronous>, transform_indices = @transform_2, window_bounds = array<i64: 8, 512>}, {pipeline_mode = #tpu.pipeline_mode<synchronous>, transform_indices = @transform_3, window_bounds = array<i64: 8, 36>}]} {
    %c0 = arith.constant 0 : index
    %c0_0 = arith.constant 0 : index
    %0 = vector.load %arg1[%c0, %c0_0] : memref<8x36xf32, #tpu.memory_space<vmem>>, vector<8x36xf32>
    %1 = arith.truncf %0 : vector<8x36xf32> to vector<8x36xbf16>
    %c0_1 = arith.constant 0 : index
    %c0_2 = arith.constant 0 : index
    %2 = vector.load %arg2[%c0_1, %c0_2] : memref<36x512xbf16, #tpu.memory_space<vmem>>, vector<36x512xbf16>
    %cst = arith.constant dense<0.000000e+00> : vector<8x512xf32>
    %3 = tpu.matmul %1, %2, %cst {dimension_numbers = #tpu.dot_dimension_numbers<[1], [0], [0], [1], [0, 0, 1, 1], [], []>} : vector<8x36xbf16>, vector<36x512xbf16>, vector<8x512xf32> -> vector<8x512xf32>
    %4 = arith.mulf %3, %3 : vector<8x512xf32>
    %cst_3 = arith.constant dense<0.000000e+00> : vector<8xf32>
    %5 = vector.multi_reduction <add>, %4, %cst_3 [1] : vector<8x512xf32> to vector<8xf32>
    %6 = vector.shape_cast %5 : vector<8xf32> to vector<8x1xf32>
    %cst_4 = arith.constant 0.001953125 : f32
    %7 = vector.broadcast %cst_4 : f32 to vector<8x1xf32>
    %8 = arith.mulf %6, %7 : vector<8x1xf32>
    %cst_5 = arith.constant 9.99999993E-9 : f32
    %9 = vector.broadcast %cst_5 : f32 to vector<8x1xf32>
    %10 = arith.addf %8, %9 : vector<8x1xf32>
    %11 = math.rsqrt %10 : vector<8x1xf32>
    %12 = vector.broadcast %11 : vector<8x1xf32> to vector<8x512xf32>
    %13 = arith.mulf %3, %12 : vector<8x512xf32>
    %c0_6 = arith.constant 0 : index
    %c0_7 = arith.constant 0 : index
    %14 = vector.load %arg3[%c0_6, %c0_7] : memref<8x512xf32, #tpu.memory_space<vmem>>, vector<8x512xf32>
    tpu.vector_store %arg3[%c0_6, %c0_7], %13 {strides = array<i32>} : memref<8x512xf32, #tpu.memory_space<vmem>>, vector<8x512xf32>,
    %15 = vector.broadcast %11 : vector<8x1xf32> to vector<8x36xf32>
    %16 = arith.mulf %0, %15 : vector<8x36xf32>
    %c0_8 = arith.constant 0 : index
    %c0_9 = arith.constant 0 : index
    %17 = vector.load %arg4[%c0_8, %c0_9] : memref<8x36xf32, #tpu.memory_space<vmem>>, vector<8x36xf32>
    tpu.vector_store %arg4[%c0_8, %c0_9], %16 {strides = array<i32>} : memref<8x36xf32, #tpu.memory_space<vmem>>, vector<8x36xf32>,
    return
  }
  func.func @transform_0(%arg0: i32) -> (i32, i32) {
    %c0_i32 = arith.constant 0 : i32
    %c0_i32_0 = arith.constant 0 : i32
    %c0_i32_1 = arith.constant 0 : i32
    return %c0_i32, %c0_i32_0 : i32, i32
  }
  func.func @transform_1(%arg0: i32) -> (i32, i32) {
    %c0_i32 = arith.constant 0 : i32
    %c0_i32_0 = arith.constant 0 : i32
    %c0_i32_1 = arith.constant 0 : i32
    return %c0_i32, %c0_i32_0 : i32, i32
  }
  func.func @transform_2(%arg0: i32) -> (i32, i32) {
    %c0_i32 = arith.constant 0 : i32
    %c0_i32_0 = arith.constant 0 : i32
    %c0_i32_1 = arith.constant 0 : i32
    return %c0_i32, %c0_i32_0 : i32, i32
  }
  func.func @transform_3(%arg0: i32) -> (i32, i32) {
    %c0_i32 = arith.constant 0 : i32
    %c0_i32_0 = arith.constant 0 : i32
    %c0_i32_1 = arith.constant 0 : i32
    return %c0_i32, %c0_i32_0 : i32, i32
  }
}

</mosaic_0001>

<bundles_post_ra>
// kernel: weight_rescaler_forward.1
= control target key start
LH: loop header
LB: loop body
LE: loop exit
PB: predicated region body
PF: predicated region fallthrough
CT: control target
= control target key end

     0   :  { %v240_v1 = vmov 0   ;;  %vm80_vm0 = vcmask 1041408   ;;  %vm76_vm1 = vcmask 293888   ;;  %s316_s1 = inlined_call_operand.vmem [shape: bf16[36,512], index: 1, kind: input, shape index: {}]   ;;  %s317_s0 = inlined_call_operand.vmem [shape: f32[8,36], index: 0, kind: input, shape index: {}]   ;;  %s318_s2 = inlined_call_operand.vmem [shape: f32[8,512], index: 2, kind: output, shape index: {0}]   ;;  %s319_s3 = inlined_call_operand.vmem [shape: f32[8,36], index: 3, kind: output, shape index: {1}]  }
   0x1   :  { %v222_v0 = vld [vmem:[%s316_s1 + $0x4] ss:$16 sps:$4 sm:$0xff]   ;;  %125 = vmatprep.mubr.bf16.mxu0 %v240_v1  ;;  %166 = vmatprep.mubr.bf16.mxu1 %v240_v1  ;;  %v224_v2 = vld [vmem:[%s316_s1 + $0xc] ss:$16 sps:$4 sm:$0xff]   ;;  %v226_v3 = vld [vmem:[%s316_s1] ss:$16 sps:$4 sm:$0xff]  }
   0x2   :  { %93 = vmatprep.subr.bf16.mxu0 %v222_v0  ;;  %v227_v4 = vld [vmem:[%s316_s1 + $0x8] ss:$16 sps:$4 sm:$0xff]   ;;  %134 = vmatprep.subr.bf16.mxu1 %v224_v2  ;;  %v228_v5 = vld [vmem:[%s316_s1 + $0x24] ss:$16 sps:$4 sm:$0xff]   ;;  %v230_v6 = vld [vmem:[%s316_s1 + $0x2c] ss:$16 sps:$4 sm:$0xff]  }
   0x3   :  { %94 = vmatpush1.bf16.msra.mxu0 %v226_v3  ;;  %135 = vmatpush1.bf16.msra.mxu1 %v227_v4  ;;  %v232_v7 = vld [vmem:[%s316_s1 + $0x20] ss:$16 sps:$4 sm:$0xff]   ;;  %v233_v8 = vld [vmem:[%s316_s1 + $0x28] ss:$16 sps:$4 sm:$0xff]  }
   0x4   :  { %95 = vmatprep.subr.bf16.mxu0 %v228_v5  ;;  %v24_v9 = vld [vmem:[%s316_s1 + $0x40] sm:$0x33]  ;;  %v25_v10 = vld [vmem:[%s316_s1 + $0x48] sm:$0x33]  ;;  %136 = vmatprep.subr.bf16.mxu1 %v230_v6 }
   0x5   :  { %v214_v11 = vcombine.high %v24_v9, %v24_v9  ;;  %v216_v12 = vcombine.high %v25_v10, %v25_v10  ;;  %v213_v13 = vcombine.low %v24_v9, %v24_v9  ;;  %v215_v14 = vcombine.low %v25_v10, %v25_v10  ;;  %v14_v15 = vld [vmem:[%s317_s0] sm:$0xff] }
   0x6   :  { %v15_v18 = vpack.c.bf16 %v14_v15, %v14_v15 }
   0x7   :  { %96 = vmatpush1.bf16.msra.mxu0 %v232_v7  ;;  %137 = vmatpush1.bf16.msra.mxu1 %v233_v8  ;;  %v82_v16 = vsel %vm80_vm0, %v213_v13, 0  ;;  %v88_v17 = vsel %vm80_vm0, %v215_v14, 0 }
   0x8   :  { %217 = vmatprep.subr.msk.bf16.mxu0 %vm80_vm0, %v214_v11  ;;  %219 = vmatprep.subr.msk.bf16.mxu1 %vm80_vm0, %v216_v12 }
   0xb   :  { %98 = vmatpush1.bf16.msra.mxu0 %v82_v16  ;;  %139 = vmatpush1.bf16.msra.mxu1 %v88_v17 }
   0xe   :  { %218 = vmatmul.mubr.msk.bf16.vlgmr.msra.gmra.mrb[0].mxu0 %vm76_vm1, %v15_v18  ;;  %220 = vmatmul.mubr.msk.bf16.vlgmr.msra.gmra.mrb[0].mxu1 %vm76_vm1, %v15_v18 }
  0xe1   :  { %v127_v19 = vpop.f32.mrb[0].mxu0  ;;  %v168_v20 = vpop.f32.mrb[0].mxu1 }
  0xe2   :  { %v175_v21 = vmul.f32 %v127_v19, %v127_v19  ;;  %v129_v22 = vpop.f32.mrb[1].mxu0  ;;  %v170_v23 = vpop.f32.mrb[1].mxu1  ;;  %v177_v24 = vmul.f32 %v168_v20, %v168_v20 }
  0xe3   :  { %v176_v25 = vmul.f32 %v129_v22, %v129_v22  ;;  %v131_v26 = vpop.f32.mrb[2].mxu0  ;;  %v172_v27 = vpop.f32.mrb[2].mxu1  ;;  %v178_v31 = vmul.f32 %v170_v23, %v170_v23 }
  0xe4   :  { %v132_v28 = vpop.f32.mrb[3].mxu0  ;;  %v173_v29 = vpop.f32.mrb[3].mxu1 }
  0xe5   :  { %v179_v30 = vadd.f32 %v176_v25, %v175_v21 }
  0xe7   :  { %v180_v32 = vadd.f32 %v179_v30, %v177_v24 }
  0xe9   :  { %v181_v33 = vadd.f32 %v180_v32, %v178_v31 }
  0xeb   :  { %182 = vadd.xlane.f32.xlu0 %v181_v33 }
 0x178   :  { %v183_v34 = vpop.xlane.xlu0 %182 }
 0x179   :  { %v184_v35 = vmul.f32 0.001953125, %v183_v34 }
 0x17b   :  { %v185_v36 = vadd.f32 1e-08, %v184_v35 }
 0x17d   :  { %238 = vrsqrt.f32 %v185_v36 }
 0x187   :  { %v239_v37 = vpop.eup %238 }
 0x188   :  { %v187_v38 = vmul.f32 %v239_v37, %v127_v19  ;;  %v188_v39 = vmul.f32 %v239_v37, %v129_v22  ;;  %v189_v40 = vmul.f32 %v239_v37, %v168_v20  ;;  %v190_v41 = vmul.f32 %v239_v37, %v170_v23 }
 0x189   :  { %v195_v42 = vmul.f32 %v239_v37, %v14_v15 }
 0x18a   :  { %191 = vst [vmem:[%s318_s2] sm:$0xff] %v187_v38  ;;  %192 = vst [vmem:[%s318_s2 + $0x8] sm:$0xff] %v188_v39 }
 0x18b   :  { %193 = vst [vmem:[%s318_s2 + $0x10] sm:$0xff] %v189_v40  ;;  %194 = vst [vmem:[%s318_s2 + $0x18] sm:$0xff] %v190_v41 }
 0x18c   :  { %196 = vst.msk [vmem:[%s319_s3] sm:$0xff] %vm76_vm1, %v195_v42 }

</bundles_post_ra>
